<compile_context>
chip_gen: v7x
topology: tpu7x:2x2x1
jax: 0.10.0
libtpu: 0.0.40
codegen_flags: <defaults>
</compile_context>

<pallas_src>
import math

import jax
import jax.numpy as jnp
from jax import lax
from jax.experimental import pallas as pl
from jax.experimental.pallas import tpu as pltpu


def self_attention_kernel(x_ref, wq_ref, wkv_ref, bq_ref, bkv_ref,
                          out_ref, attn_ref, k_scr, v_scr):
    # x_ref:   (1, S, D)  full sequence for this batch element
    # wq_ref:  (D, D)     query weight, (in, out) layout, 1/sqrt(D) pre-folded
    # wkv_ref: (D, 2D)    fused key/value weight, (in, out) layout
    # bq_ref:  (1, D)     scaled query bias (f32)
    # bkv_ref: (1, 2D)    fused key/value bias (f32)
    # out_ref: (1, TQ, D) output tile, attn_ref: (1, TQ, S) attention tile
    # k_scr/v_scr: (S, D) VMEM scratch, persistent across the query-tile axis.
    qi = pl.program_id(1)
    D = out_ref.shape[-1]
    TQ = out_ref.shape[-2]
    cdt = wq_ref.dtype  # MXU operand dtype (bf16 in perf mode, f32 otherwise)

    # ---- K/V projection: once per batch element, kept resident in VMEM ----
    @pl.when(qi == 0)
    def _():
        xs = x_ref[0].astype(cdt)                                   # (S, D)
        kv = jnp.dot(xs, wkv_ref[...],
                     preferred_element_type=jnp.float32) + bkv_ref[...]  # (S, 2D)
        k_scr[...] = kv[:, :D].astype(k_scr.dtype)
        v_scr[...] = kv[:, D:].astype(v_scr.dtype)

    # ---- Q projection for this query tile (scale already folded in) ----
    qs = pl.multiple_of(qi * TQ, TQ)
    xq = x_ref[0, pl.ds(qs, TQ), :].astype(cdt)                     # (TQ, D)
    q = jnp.dot(xq, wq_ref[...],
                preferred_element_type=jnp.float32) + bq_ref[...]   # (TQ, D) f32

    # ---- scores = q @ k^T with no in-kernel transpose (contract last dims) ----
    scores = lax.dot_general(
        q.astype(cdt), k_scr[...],
        dimension_numbers=(((1,), (1,)), ((), ())),
        preferred_element_type=jnp.float32)                         # (TQ, S)

    # ---- numerically stable softmax (f32), EUP reciprocal for the denom ----
    m = jnp.max(scores, axis=-1, keepdims=True)
    e = jnp.exp(scores - m)
    denom = jnp.sum(e, axis=-1, keepdims=True)
    # approx=False keeps exact softmax weights (they are a module output).
    attn = e * pl.reciprocal(denom, approx=False)                   # (TQ, S)

    # ---- weighted sum ----
    out = jnp.dot(attn.astype(cdt), v_scr[...],
                  preferred_element_type=jnp.float32)               # (TQ, D)

    out_ref[0] = out.astype(out_ref.dtype)
    attn_ref[0] = attn.astype(attn_ref.dtype)


def _pick_query_tile(S):
    """Largest convenient query tile. Small S -> single tile (full-dim block)."""
    if S <= 256:
        return S
    for tq in (512, 256, 128, 64, 32, 16, 8):
        if S % tq == 0:
            return tq
    # TODO(synk): pad + mask ragged sequence lengths instead of a monolithic tile.
    return S


def self_attention(x, wq, bq, wk, bk, wv, bv, *, use_bf16_matmul=False):
    """PyTorch SelfAttention forward. Weights are PyTorch-style (out, in)."""
    B, S, D = x.shape
    cdt = jnp.bfloat16 if use_bf16_matmul else x.dtype

    scale = 1.0 / math.sqrt(D)
    # Pre-transpose once to (in, out) layout; fold 1/sqrt(D) into the Q branch.
    wq_t = (wq.T * scale).astype(cdt)                                # (D, D)
    wkv_t = jnp.concatenate([wk.T, wv.T], axis=1).astype(cdt)        # (D, 2D)
    bq2 = (bq * scale).reshape(1, D).astype(jnp.float32)             # (1, D)
    bkv2 = jnp.concatenate([bk, bv]).reshape(1, 2 * D).astype(jnp.float32)

    TQ = _pick_query_tile(S)
    n_q = S // TQ

    grid_spec = pltpu.PrefetchScalarGridSpec(
        num_scalar_prefetch=0,
        grid=(B, n_q),
        in_specs=[
            pl.BlockSpec((1, S, D), lambda b, qi: (b, 0, 0)),      # x (full seq)
            pl.BlockSpec((D, D), lambda b, qi: (0, 0)),            # wq (scaled)
            pl.BlockSpec((D, 2 * D), lambda b, qi: (0, 0)),        # fused wk|wv
            pl.BlockSpec((1, D), lambda b, qi: (0, 0)),            # bq (scaled)
            pl.BlockSpec((1, 2 * D), lambda b, qi: (0, 0)),        # fused bk|bv
        ],
        out_specs=[
            pl.BlockSpec((1, TQ, D), lambda b, qi: (b, qi, 0)),    # output
            pl.BlockSpec((1, TQ, S), lambda b, qi: (b, qi, 0)),    # attn weights
        ],
        scratch_shapes=[
            pltpu.VMEM((S, D), cdt),   # K, resident across query tiles
            pltpu.VMEM((S, D), cdt),   # V, resident across query tiles
        ],
    )

    out, attn = pl.pallas_call(
        self_attention_kernel,
        out_shape=(
            jax.ShapeDtypeStruct((B, S, D), x.dtype),
            jax.ShapeDtypeStruct((B, S, S), x.dtype),
        ),
        grid_spec=grid_spec,
        compiler_params=pltpu.CompilerParams(
            dimension_semantics=("parallel", "arbitrary"),
            vmem_limit_bytes=48 * 1024 * 1024),
    )(x, wq_t, wkv_t, bq2, bkv2)
    return out, attn


def reference_self_attention(x, wq, bq, wk, bk, wv, bv):
    q = jnp.einsum("bsd,od->bso", x, wq) + bq
    k = jnp.einsum("bsd,od->bso", x, wk) + bk
    v = jnp.einsum("bsd,od->bso", x, wv) + bv
    scores = jnp.einsum("bqd,bkd->bqk", q, k) / jnp.sqrt(jnp.float32(x.shape[-1]))
    attn = jax.nn.softmax(scores, axis=-1)
    out = jnp.einsum("bqk,bkd->bqd", attn, v)
    return out, attn


if __name__ == "__main__":
    B, S, D = 2, 8, 32  # batch, seq, hidden (input_dim)

    key = jax.random.PRNGKey(0)
    kx, kwq, kbq, kwk, kbk, kwv, kbv = jax.random.split(key, 7)

    x = jax.random.normal(kx, (B, S, D), dtype=jnp.float32)

    # nn.Linear(input_dim, input_dim) -> weight (D, D) = (out, in), bias (D,)
    lim = 1.0 / math.sqrt(D)
    wq = jax.random.uniform(kwq, (D, D), jnp.float32, -lim, lim)
    bq = jax.random.uniform(kbq, (D,), jnp.float32, -lim, lim)
    wk = jax.random.uniform(kwk, (D, D), jnp.float32, -lim, lim)
    bk = jax.random.uniform(kbk, (D,), jnp.float32, -lim, lim)
    wv = jax.random.uniform(kwv, (D, D), jnp.float32, -lim, lim)
    bv = jax.random.uniform(kbv, (D,), jnp.float32, -lim, lim)

    out_ref, attn_ref = reference_self_attention(x, wq, bq, wk, bk, wv, bv)

    # Exact (f32) path: must match the PyTorch-equivalent reference tightly.
    out, attn = self_attention(x, wq, bq, wk, bk, wv, bv)
    out, attn = jax.block_until_ready((out, attn))
    assert jnp.allclose(out, out_ref, atol=1e-5, rtol=1e-5), "output mismatch (f32)"
    assert jnp.allclose(attn, attn_ref, atol=1e-5, rtol=1e-5), "attn mismatch (f32)"

    # Perf path: bf16 MXU operands with f32 accumulation (looser tolerance).
    out16, attn16 = self_attention(x, wq, bq, wk, bk, wv, bv, use_bf16_matmul=True)
    out16, attn16 = jax.block_until_ready((out16, attn16))
    assert jnp.allclose(out16, out_ref, atol=5e-2, rtol=5e-2), "output mismatch (bf16)"
    assert jnp.allclose(attn16, attn_ref, atol=5e-2, rtol=5e-2), "attn mismatch (bf16)"

    print("KERNEL_OK")
</pallas_src>

<mosaic_0001>
module attributes {stable_mosaic.version = 11 : i64} {
  func.func @self_attention_kernel(%arg0: i32, %arg1: i32, %arg2: memref<1x8x32xf32, #tpu.memory_space<vmem>>, %arg3: memref<32x32xf32, #tpu.memory_space<vmem>>, %arg4: memref<32x64xf32, #tpu.memory_space<vmem>>, %arg5: memref<1x32xf32, #tpu.memory_space<vmem>>, %arg6: memref<1x64xf32, #tpu.memory_space<vmem>>, %arg7: memref<1x8x32xf32, #tpu.memory_space<vmem>>, %arg8: memref<1x8x8xf32, #tpu.memory_space<vmem>>, %arg9: memref<8x32xf32, #tpu.memory_space<vmem>>, %arg10: memref<8x32xf32, #tpu.memory_space<vmem>>) attributes {dimension_semantics = [#tpu.dimension_semantics<parallel>, #tpu.dimension_semantics<arbitrary>], iteration_bounds = array<i64: 2, 1>, scalar_prefetch = 0 : i64, scratch_operands = 2 : i64, tpu.core_type = #tpu.core_type<tc>, window_params = [{transform_indices = @transform_0, window_bounds = array<i64: 1, 8, 32>}, {pipeline_mode = #tpu.pipeline_mode<synchronous>, transform_indices = @transform_1, window_bounds = array<i64: 32, 32>}, {pipeline_mode = #tpu.pipeline_mode<synchronous>, transform_indices = @transform_2, window_bounds = array<i64: 32, 64>}, {pipeline_mode = #tpu.pipeline_mode<synchronous>, transform_indices = @transform_3, window_bounds = array<i64: 1, 32>}, {pipeline_mode = #tpu.pipeline_mode<synchronous>, transform_indices = @transform_4, window_bounds = array<i64: 1, 64>}, {transform_indices = @transform_5, window_bounds = array<i64: 1, 8, 32>}, {transform_indices = @transform_6, window_bounds = array<i64: 1, 8, 8>}]} {
    %c0_i32 = arith.constant 0 : i32
    %0 = arith.cmpi eq, %arg1, %c0_i32 : i32
    %1 = arith.extui %0 : i1 to i32
    %c0_i32_0 = arith.constant 0 : i32
    %2 = arith.cmpi ne, %1, %c0_i32_0 : i32
    scf.if %2 {
      %c0_20 = arith.constant 0 : index
      %c0_21 = arith.constant 0 : index
      %c0_22 = arith.constant 0 : index
      %33 = vector.load %arg2[%c0_20, %c0_21, %c0_22] : memref<1x8x32xf32, #tpu.memory_space<vmem>>, vector<1x8x32xf32>
      %34 = vector.shape_cast %33 : vector<1x8x32xf32> to vector<8x32xf32>
      %c0_23 = arith.constant 0 : index
      %c0_24 = arith.constant 0 : index
      %35 = vector.load %arg4[%c0_23, %c0_24] : memref<32x64xf32, #tpu.memory_space<vmem>>, vector<32x64xf32>
      %cst_25 = arith.constant dense<0.000000e+00> : vector<8x64xf32>
      %36 = tpu.matmul %34, %35, %cst_25 {dimension_numbers = #tpu.dot_dimension_numbers<[1], [0], [0], [1], [0, 0, 1, 1], [], []>} : vector<8x32xf32>, vector<32x64xf32>, vector<8x64xf32> -> vector<8x64xf32>
      %c0_26 = arith.constant 0 : index
      %c0_27 = arith.constant 0 : index
      %37 = vector.load %arg6[%c0_26, %c0_27] : memref<1x64xf32, #tpu.memory_space<vmem>>, vector<1x64xf32>
      %38 = vector.broadcast %37 : vector<1x64xf32> to vector<8x64xf32>
      %39 = arith.addf %36, %38 : vector<8x64xf32>
      %40 = vector.extract_strided_slice %39 {offsets = [0, 0], sizes = [8, 32], strides = [1, 1]} : vector<8x64xf32> to vector<8x32xf32>
      %c0_28 = arith.constant 0 : index
      %c0_29 = arith.constant 0 : index
      %41 = vector.load %arg9[%c0_28, %c0_29] : memref<8x32xf32, #tpu.memory_space<vmem>>, vector<8x32xf32>
      tpu.vector_store %arg9[%c0_28, %c0_29], %40 {strides = array<i32>} : memref<8x32xf32, #tpu.memory_space<vmem>>, vector<8x32xf32>,
      %42 = vector.extract_strided_slice %39 {offsets = [0, 32], sizes = [8, 32], strides = [1, 1]} : vector<8x64xf32> to vector<8x32xf32>
      %c0_30 = arith.constant 0 : index
      %c0_31 = arith.constant 0 : index
      %43 = vector.load %arg10[%c0_30, %c0_31] : memref<8x32xf32, #tpu.memory_space<vmem>>, vector<8x32xf32>
      tpu.vector_store %arg10[%c0_30, %c0_31], %42 {strides = array<i32>} : memref<8x32xf32, #tpu.memory_space<vmem>>, vector<8x32xf32>,
    } else {
    }
    %c8_i32 = arith.constant 8 : i32
    %3 = arith.muli %arg1, %c8_i32 : i32
    %4 = tpu.assume_multiple %3, 8 : i32
    %c0 = arith.constant 0 : index
    %5 = arith.index_cast %4 : i32 to index
    %c0_1 = arith.constant 0 : index
    %6 = vector.load %arg2[%c0, %5, %c0_1] : memref<1x8x32xf32, #tpu.memory_space<vmem>>, vector<1x8x32xf32>
    %7 = vector.shape_cast %6 : vector<1x8x32xf32> to vector<8x32xf32>
    %c0_2 = arith.constant 0 : index
    %c0_3 = arith.constant 0 : index
    %8 = vector.load %arg3[%c0_2, %c0_3] : memref<32x32xf32, #tpu.memory_space<vmem>>, vector<32x32xf32>
    %cst = arith.constant dense<0.000000e+00> : vector<8x32xf32>
    %9 = tpu.matmul %7, %8, %cst {dimension_numbers = #tpu.dot_dimension_numbers<[1], [0], [0], [1], [0, 0, 1, 1], [], []>} : vector<8x32xf32>, vector<32x32xf32>, vector<8x32xf32> -> vector<8x32xf32>
    %c0_4 = arith.constant 0 : index
    %c0_5 = arith.constant 0 : index
    %10 = vector.load %arg5[%c0_4, %c0_5] : memref<1x32xf32, #tpu.memory_space<vmem>>, vector<1x32xf32>
    %11 = vector.broadcast %10 : vector<1x32xf32> to vector<8x32xf32>
    %12 = arith.addf %9, %11 : vector<8x32xf32>
    %c0_6 = arith.constant 0 : index
    %c0_7 = arith.constant 0 : index
    %13 = vector.load %arg9[%c0_6, %c0_7] : memref<8x32xf32, #tpu.memory_space<vmem>>, vector<8x32xf32>
    %cst_8 = arith.constant dense<0.000000e+00> : vector<8x8xf32>
    %14 = tpu.matmul %12, %13, %cst_8 {dimension_numbers = #tpu.dot_dimension_numbers<[1], [1], [0], [0], [0, 0, 1, 0], [], []>} : vector<8x32xf32>, vector<8x32xf32>, vector<8x8xf32> -> vector<8x8xf32>
    %cst_9 = arith.constant dense<0xFF800000> : vector<8xf32>
    %15 = vector.multi_reduction <maximumf>, %14, %cst_9 [1] : vector<8x8xf32> to vector<8xf32>
    %16 = vector.shape_cast %15 : vector<8xf32> to vector<8x1xf32>
    %17 = vector.broadcast %16 : vector<8x1xf32> to vector<8x8xf32>
    %18 = arith.subf %14, %17 : vector<8x8xf32>
    %19 = math.exp %18 : vector<8x8xf32>
    %cst_10 = arith.constant dense<0.000000e+00> : vector<8xf32>
    %20 = vector.multi_reduction <add>, %19, %cst_10 [1] : vector<8x8xf32> to vector<8xf32>
    %21 = vector.shape_cast %20 : vector<8xf32> to vector<8x1xf32>
    %22 = tpu.reciprocal %21 : vector<8x1xf32> -> vector<8x1xf32>
    %23 = vector.broadcast %22 : vector<8x1xf32> to vector<8x8xf32>
    %24 = arith.mulf %19, %23 : vector<8x8xf32>
    %c0_11 = arith.constant 0 : index
    %c0_12 = arith.constant 0 : index
    %25 = vector.load %arg10[%c0_11, %c0_12] : memref<8x32xf32, #tpu.memory_space<vmem>>, vector<8x32xf32>
    %cst_13 = arith.constant dense<0.000000e+00> : vector<8x32xf32>
    %26 = tpu.matmul %24, %25, %cst_13 {dimension_numbers = #tpu.dot_dimension_numbers<[1], [0], [0], [1], [0, 0, 1, 1], [], []>} : vector<8x8xf32>, vector<8x32xf32>, vector<8x32xf32> -> vector<8x32xf32>
    %c0_14 = arith.constant 0 : index
    %c0_15 = arith.constant 0 : index
    %c0_16 = arith.constant 0 : index
    %27 = vector.load %arg7[%c0_14, %c0_15, %c0_16] : memref<1x8x32xf32, #tpu.memory_space<vmem>>, vector<1x8x32xf32>
    %28 = vector.shape_cast %27 : vector<1x8x32xf32> to vector<8x32xf32>
    %29 = vector.shape_cast %26 : vector<8x32xf32> to vector<1x8x32xf32>
    tpu.vector_store %arg7[%c0_14, %c0_15, %c0_16], %29 {strides = array<i32>} : memref<1x8x32xf32, #tpu.memory_space<vmem>>, vector<1x8x32xf32>,
    %c0_17 = arith.constant 0 : index
    %c0_18 = arith.constant 0 : index
    %c0_19 = arith.constant 0 : index
    %30 = vector.load %arg8[%c0_17, %c0_18, %c0_19] : memref<1x8x8xf32, #tpu.memory_space<vmem>>, vector<1x8x8xf32>
    %31 = vector.shape_cast %30 : vector<1x8x8xf32> to vector<8x8xf32>
    %32 = vector.shape_cast %24 : vector<8x8xf32> to vector<1x8x8xf32>
    tpu.vector_store %arg8[%c0_17, %c0_18, %c0_19], %32 {strides = array<i32>} : memref<1x8x8xf32, #tpu.memory_space<vmem>>, vector<1x8x8xf32>,
    return
  }
  func.func @transform_0(%arg0: i32, %arg1: i32) -> (i32, i32, i32) {
    %c0_i32 = arith.constant 0 : i32
    %c0_i32_0 = arith.constant 0 : i32
    %c0_i32_1 = arith.constant 0 : i32
    return %arg0, %c0_i32, %c0_i32_0 : i32, i32, i32
  }
  func.func @transform_1(%arg0: i32, %arg1: i32) -> (i32, i32) {
    %c0_i32 = arith.constant 0 : i32
    %c0_i32_0 = arith.constant 0 : i32
    %c0_i32_1 = arith.constant 0 : i32
    return %c0_i32, %c0_i32_0 : i32, i32
  }
  func.func @transform_2(%arg0: i32, %arg1: i32) -> (i32, i32) {
    %c0_i32 = arith.constant 0 : i32
    %c0_i32_0 = arith.constant 0 : i32
    %c0_i32_1 = arith.constant 0 : i32
    return %c0_i32, %c0_i32_0 : i32, i32
  }
  func.func @transform_3(%arg0: i32, %arg1: i32) -> (i32, i32) {
    %c0_i32 = arith.constant 0 : i32
    %c0_i32_0 = arith.constant 0 : i32
    %c0_i32_1 = arith.constant 0 : i32
    return %c0_i32, %c0_i32_0 : i32, i32
  }
  func.func @transform_4(%arg0: i32, %arg1: i32) -> (i32, i32) {
    %c0_i32 = arith.constant 0 : i32
    %c0_i32_0 = arith.constant 0 : i32
    %c0_i32_1 = arith.constant 0 : i32
    return %c0_i32, %c0_i32_0 : i32, i32
  }
  func.func @transform_5(%arg0: i32, %arg1: i32) -> (i32, i32, i32) {
    %c0_i32 = arith.constant 0 : i32
    %c0_i32_0 = arith.constant 0 : i32
    return %arg0, %arg1, %c0_i32 : i32, i32, i32
  }
  func.func @transform_6(%arg0: i32, %arg1: i32) -> (i32, i32, i32) {
    %c0_i32 = arith.constant 0 : i32
    %c0_i32_0 = arith.constant 0 : i32
    return %arg0, %arg1, %c0_i32 : i32, i32, i32
  }
}

</mosaic_0001>

<bundles_post_ra>
// kernel: tpu_custom_call.1
= control target key start
LH: loop header
LB: loop body
LE: loop exit
PB: predicated region body
PF: predicated region fallthrough
CT: control target
= control target key end

     0   :  { %12 = vsyncpa [#allocation5], 0  ;;  %s1577_s0 = inlined_call_operand.hbm [shape: f32[2,8,32], index: 0, kind: input, shape index: {}]   ;;  %s1578_s1 = inlined_call_operand.hbm [shape: f32[32,32], index: 1, kind: input, shape index: {}]   ;;  %s1579_s2 = inlined_call_operand.hbm [shape: f32[32,64], index: 2, kind: input, shape index: {}]   ;;  %s1580_s3 = inlined_call_operand.vmem [shape: f32[1,32], index: 3, kind: input, shape index: {}]   ;;  %s1581_s4 = inlined_call_operand.vmem [shape: f32[1,64], index: 4, kind: input, shape index: {}]   ;;  %s1582_s5 = inlined_call_operand.hbm [shape: f32[2,8,32], index: 5, kind: output, shape index: {0}]   ;;  %s1583_s6 = inlined_call_operand.hbm [shape: f32[2,8,8], index: 6, kind: output, shape index: {1}]  }
   0x1   :  { %14 = vsyncpa [#allocation5 + $0x1], 0 }
   0x2   :  { %15 = vsyncpa [#allocation8], 0 }
   0x3   :  { %16 = vsyncpa [#allocation6], 0 }
   0x4   :  { %18 = vsyncpa [#allocation6 + $0x1], 0 }
   0x5   :  { %19 = vsyncpa [#allocation12], 0 }
   0x6   :  { %21 = vsyncpa [#allocation12 + $0x1], 0  ;;  %s1274_s21 = smov 0   ;;  %s1276_s22 = smov 0  }
   0x7   :  { %s1278_s23 = smov 0   ;;  %s1280_s24 = smov 0  }
   0x8   :  { %s1282_s25 = smov 0   ;;  %s1284_s26 = smov 0  }
   0x9 LB: > { %s839_s27 = sadd.s32 4294967295, %s1226_s26   ;;  %s840_s28 = sadd.s32 4294967294, %s1226_s26   ;;  %s1226_s26 = sphi %s1284_s26, %s27_s26   ;;  %s1222_s25 = sphi %s1282_s25, %s1608_s25   ;;  %s1218_s24 = sphi %s1280_s24, %s1607_s24   ;;  %s1214_s23 = sphi %s1278_s23, %s1606_s23   ;;  %s1210_s22 = sphi %s1276_s22, %s1605_s22   ;;  %s1206_s21 = sphi %s1274_s21, %s1604_s21  }
   0xa   : > { %p59_p0 = scmp.ne.s32.totalorder %s1210_s22, %s1206_s21  ;;  %p1308_p1 = scmp.eq.s32.totalorder %s839_s27, 0 }
   0xb   : > { %p1312_p2 = scmp.eq.s32.totalorder %s839_s27, 1  ;;  %p175_p3 = scmp.eq.s32.totalorder %s840_s28, 1 }
   0xc   : > { %s1589_s29 = scalar_select %p1308_p1, 1, 0 }
   0xd   : > { %p1318_p4 = por %p1308_p1, %p59_p0  ;;  %p841_p5 = scmp.ge.s32.totalorder %s1226_s26, 1 }
   0xe   : > { %p1323_p6 = por %p175_p3, %p59_p0  ;;  %p210_p7 = scmp.lt.s32.totalorder %s1226_s26, 3 }
   0xf   : > { %s1591_s7 = scalar_select %p1318_p4, 1, 0 }
  0x10   : > { %s1592_s8 = scalar_select %p1323_p6, 1, 0 }
  0x11   : > { %p1328_p8 = pnand %p841_p5, %p210_p7  ;;  %s1228_s10 = smov [#allocation7]  }
  0x12   : > { %1593 = sst [smem:[#allocation17_spill]] %s1592_s8  ;;  %s222_s11 = sshll.u32 %s1228_s10, 4  ;;  %s1332_s11 = int_to_ptr.vmem [resolvable:$true] %s222_s11 }
  0x13   : > { %p938_p9 = pneg %p1328_p8  ;;  %s1229_s13 = smov [#allocation9]  }
  0x14   : > { %s235_s14 = sshll.u32 %s1229_s13, 4  ;;  %s1022_s17 = scalar_lea.hbm %s1578_s1, 512  ;;  %s1343_s14 = int_to_ptr.vmem [resolvable:$true] %s235_s14 }
  0x15   : > { %p1339_p11 = pnand %p938_p9, %p1308_p1  ;;  %p1023_p12 = scmp.ne.s32.totalorder %s1578_s1, %s1022_s17 }
  0x16   : > { %p1029_p5 = scmp.lt.u32.totalorder %s1022_s17, %s1578_s1 }
  0x17   : > { %p1024_p13 = pneg %p1339_p11 }
  0x19   : > { %p1025_p0 = pnand %p1024_p13, %p1023_p12 }
  0x1b   : > { %p1026_p3 = pneg %p1025_p0 }
  0x1d   : > { %p1031_p7 = pnand %p1029_p5, %p1026_p3 }
  0x1f   : > { %1034 = shalt.err (!%p1031_p7)
}
  0x20   : > { %s1035_s28 = scalar_lea.vmem %s1332_s11, 512  ;;  %p1043_p1 = scmp.lt.s32.totalorder %s1332_s11, %s1332_s11 }
  0x21   : > { %p1036_p9 = scmp.ne.s32.totalorder %s1332_s11, %s1035_s28  ;;  %p1044_p12 = scmp.lt.s32.totalorder %s1035_s28, %s1035_s28 }
  0x23   : > { %p1038_p10 = pnand %p1036_p9, %p1024_p13  ;;  %p1045_p0 = por %p1044_p12, %p1043_p1 }
  0x25   : > { %p1039_p6 = pneg %p1038_p10 }
  0x27   : > { %p1046_p4 = pnand %p1045_p0, %p1039_p6 }
  0x29   : > { %1049 = shalt.err (!%p1046_p4)
}
  0x2a   : > { %s1230_s10 = smov 128   ;;  %s1231_s13 = smov 8  }
  0x2b   : > { %941 = dma.hbm_to_vmem [thread:$0]  (!%p1339_p11), %s1578_s1, 512, %s1332_s11, [#allocation8], %s1230_s10, %s1230_s10, %s1231_s13  }
  0x2c   : > { %s1050_s19 = scalar_lea.hbm %s1579_s2, 512 }
  0x2d   : > { %p1051_p1 = scmp.ne.s32.totalorder %s1579_s2, %s1050_s19  ;;  %p1057_p10 = scmp.lt.u32.totalorder %s1050_s19, %s1579_s2 }
  0x2f   : > { %p1053_p4 = pnand %p1051_p1, %p1024_p13 }
  0x31   : > { %p1054_p6 = pneg %p1053_p4 }
  0x33   : > { %p1059_p3 = pnand %p1057_p10, %p1054_p6 }
  0x35   : > { %1062 = shalt.err (!%p1059_p3)
}
  0x36   : > { %s1063_s11 = scalar_lea.vmem %s1343_s14, 512  ;;  %p1071_p12 = scmp.lt.s32.totalorder %s1343_s14, %s1343_s14 }
  0x37   : > { %p1064_p5 = scmp.ne.s32.totalorder %s1343_s14, %s1063_s11  ;;  %p1072_p0 = scmp.lt.s32.totalorder %s1063_s11, %s1063_s11 }
  0x39   : > { %p1066_p7 = pnand %p1064_p5, %p1024_p13  ;;  %p1073_p1 = por %p1072_p0, %p1071_p12 }
  0x3b   : > { %p1067_p9 = pneg %p1066_p7 }
  0x3d   : > { %p1074_p4 = pnand %p1073_p1, %p1067_p9 }
  0x3f   : > { %1077 = shalt.err (!%p1074_p4)
}
  0x40   : > { %944 = dma.hbm_to_vmem [thread:$0]  (!%p1339_p11), %s1579_s2, 512, %s1343_s14, [#allocation8], %s1230_s10, %s1230_s10, %s1231_s13  }
  0x41   : > { %s39_s16 = sadd.s32 1, %s1222_s25  ;;  %s46_s17 = sadd.s32 1, %s1214_s23 }
  0x42   : > { %p41_p13 = scmp.ge.s32.totalorder %s39_s16, 2  ;;  %p53_p6 = scmp.ne.s32.totalorder %s1214_s23, %s1210_s22 }
  0x43   : > { %p54_p10 = scmp.eq.s32.totalorder %s1226_s26, 0  ;;  %p958_p3 = scmp.lt.s32.totalorder %s1226_s26, 2 }
  0x44   : > { %s1610_s16 = smov (%p41_p13, %s39_s16), 0  ;;  %p1407_p7 = por %p1312_p2, %p53_p6 }
  0x45   : > { %p55_p5 = por %p54_p10, %p53_p6  ;;  %s43_s18 = ssub.s32 %s1222_s25, %s1610_s16 }
  0x46   : > { %s1596_s12 = scalar_select %p1407_p7, 1, 0 }
  0x47   : > { %s255_s19 = sand.u32 1, %s1214_s23   ;;  %p44_p9 = scmp.eq.s32.totalorder %s43_s18, 0 }
  0x48   : > { %s845_s14 = sshll.u32 %s255_s19, 3  ;;  %s846_s10 = sshll.u32 %s1222_s25, 7 }
  0x49   : > { %s1416_s13 = scalar_select %p44_p9, %s1214_s23, %s46_s17  }
  0x4a   : > { %s1421_s28 = scalar_lea.hbm %s1577_s0, %s846_s10  ;;  %s259_s30 = scalar_lea.vmem [#allocation4], %s845_s14 }
  0x4b   : > { %s266_s11 = sshll.u32 %s259_s30, 4  ;;  %p1425_p2 = pnand %p958_p3, %p55_p5  ;;  %s1429_s11 = int_to_ptr.vmem [resolvable:$true] %s266_s11 }
  0x4c   : > { %s256_s15 = scalar_lea.sflag [#allocation5], %s255_s19  ;;  %s1078_s17 = scalar_lea.hbm %s1421_s28, 128 }
  0x4d   : > { %p1079_p11 = scmp.ne.s32.totalorder %s1421_s28, %s1078_s17  ;;  %p1080_p12 = pneg %p1425_p2 }
  0x4e   : > { %s1083_s10 = scalar_lea.hbm %s1577_s0, 256  ;;  %p1084_p4 = scmp.lt.u32.totalorder %s1421_s28, %s1577_s0 }
  0x4f   : > { %p1081_p0 = pnand %p1080_p12, %p1079_p11  ;;  %p1085_p13 = scmp.lt.u32.totalorder %s1083_s10, %s1078_s17 }
  0x50   : > { %p1087_p10 = scmp.lt.u32.totalorder %s1078_s17, %s1421_s28 }
  0x51   : > { %p1082_p1 = pneg %p1081_p0  ;;  %p1086_p6 = por %p1085_p13, %p1084_p4 }
  0x53   : > { %p1088_p3 = por %p1087_p10, %p1086_p6 }
  0x55   : > { %p1089_p5 = pnand %p1088_p3, %p1082_p1 }
  0x57   : > { %1092 = shalt.err (!%p1089_p5)
}
  0x58   : > { %s1093_s19 = scalar_lea.vmem %s1429_s11, 128  ;;  %s1232_s30 = smov [#allocation4]  }
  0x59   : > { %p1094_p9 = scmp.ne.s32.totalorder %s1429_s11, %s1093_s19  ;;  %s1098_s18 = sshll.u32 %s1232_s30, 4  ;;  %s1099_s18 = int_to_ptr.vmem [resolvable:$false] %s1098_s18 }
  0x5a   : > { %s1100_s14 = scalar_lea.vmem %s1099_s18, 256  ;;  %p1101_p7 = scmp.lt.s32.totalorder %s1429_s11, %s1099_s18 }
  0x5b   : > { %p1096_p11 = pnand %p1094_p9, %p1080_p12  ;;  %p1102_p4 = scmp.lt.s32.totalorder %s1100_s14, %s1093_s19 }
  0x5d   : > { %p1097_p0 = pneg %p1096_p11  ;;  %p1103_p13 = por %p1102_p4, %p1101_p7 }
  0x5f   : > { %p1104_p6 = pnand %p1103_p13, %p1097_p0 }
  0x61   : > { %1107 = shalt.err (!%p1104_p6)
}
  0x62   : > { %948 = dma.hbm_to_vmem [thread:$0]  (!%p1425_p2), %s1421_s28, 128, %s1429_s11, %s256_s15  }
  0x63   : > { %275 = sbr.rel (%p1328_p8) target bundleno = 1098 (0x44a), region = 40  ;;  %s1459_s17 = sand.u32 (!%p1328_p8), 1, %s1210_s22  }
  0x64   : > { %s1462_s10 = sshll.u32 (!%p1328_p8), %s1459_s17, 3  ;;  %s278_s20 = scalar_lea.sflag (!%p1328_p8), [#allocation5], %s1459_s17 }
  0x65   : > { %s281_s27 = scalar_lea.vmem (!%p1328_p8), [#allocation4], %s1462_s10  ;;  %p1598_p7 = scmp.ne.s32.totalorder (!%p1328_p8), %s1591_s7, 0 }
  0x6a   : > { %1189 = dma.done.wait (%p1598_p7), %s278_s20, 128  }
  0x6b   : > { %1191 = vsyncadd (%p1598_p7), %s278_s20, 4294967168  ;;  %p1599_p2 = scmp.ne.s32.totalorder %s1589_s29, 0 }
  0x6d   : > { %1193 = dma.done.wait (%p1599_p2), [#allocation8], 1024  }
  0x6e   : > { %1195 = vsyncadd (%p1599_p2), [#allocation8], 4294966272  ;;  %v1233_v0 = vmov 0.0|0.0   ;;  %vm1234_vm0 = vmmov 0   ;;  %v1235_v1 = vmov 0.0   ;;  %v328_v2 = vld [vmem:[#allocation9] sm:$0xff] }
  0x6f   : > { %912 = vmatprep.subr.bf16.mxu0 %v1233_v0  ;;  %888 = vmatprep.mubr.msk.f32.mxu0 %vm1234_vm0, %v1235_v1  ;;  %v329_v3 = vld [vmem:[#allocation9 + $0x8] sm:$0xff]  ;;  %v330_v4 = vld [vmem:[#allocation9 + $0x10] sm:$0xff]  ;;  %v331_v6 = vld [vmem:[#allocation9 + $0x18] sm:$0xff]  ;;  %vm339_vm1 = vcmask 261120   ;;  %s1236_s9 = smov 96   ;;  %vm584_vm2 = vcmask 64512  }
  0x70   : > { %918 = vmatprep.subr.bf16.mxu1 %v1233_v0  ;;  %899 = vmatprep.mubr.msk.f32.mxu1 %vm1234_vm0, %v1235_v1  ;;  %v913_v5 = vpack.c.bf16 %v329_v3, %v328_v2  ;;  %v422_v7 = vld [vmem:[#allocation7] sm:$0xff]  ;;  %v423_v8 = vld [vmem:[#allocation7 + $0x8] sm:$0xff]  ;;  %v424_v9 = vld [vmem:[#allocation7 + $0x10] sm:$0xff]  ;;  %v916_v11 = vpack.c.bf16 %v331_v6, %v330_v4  ;;  %s322_s8 = scalar_lea.vmem [#allocation11], %s1462_s10  ;;  %s862_s15 = sshll.u32 %s1218_s24, 7 }
  0x71   : > { %v425_v10 = vld [vmem:[#allocation7 + $0x18] sm:$0xff]  ;;  %v919_v12 = vpack.c.bf16 %v423_v8, %v422_v7  ;;  %v853_v15 = vld [vmem:[%s1581_s4] ss:$0 sm:$0xff]  ;;  %s1501_s18 = scalar_lea.hbm %s1583_s6, %s862_s15  ;;  %s706_s14 = sshll.u32 %s322_s8, 4  ;;  %s707_s14 = int_to_ptr.vmem [resolvable:$true] %s706_s14 }
  0x72   : > { %914 = vmatpush3.bf16.msra.mxu0 %v913_v5  ;;  %v922_v13 = vpack.c.bf16 %v425_v10, %v424_v9  ;;  %v327_v14 = vld [vmem:[%s281_s27] sm:$0xff]  ;;  %v855_v21 = vld [vmem:[%s1580_s3] ss:$0 sm:$0xff]  ;;  %s678_s20 = scalar_lea.sflag [#allocation12], %s1459_s17  ;;  %s1108_s27 = scalar_lea.vmem %s707_s14, 128 }
  0x73   : > { %915 = vmatprep.subr.bf16.mxu0 %v1233_v0  ;;  %920 = vmatpush3.bf16.msra.mxu1 %v919_v12  ;;  %p1109_p8 = scmp.ne.s32.totalorder %s707_s14, %s1108_s27  ;;  %p1600_p12 = scmp.ne.s32.totalorder %s1596_s12, 0 }
  0x74   : > { %921 = vmatprep.subr.bf16.mxu1 %v1233_v0  ;;  %s1237_s29 = smov [#allocation11]  }
  0x75   : > { %p1110_p1 = pnand %p1109_p8, %p1600_p12  ;;  %s1112_s7 = sshll.u32 %s1237_s29, 4  ;;  %s1113_s7 = int_to_ptr.vmem [resolvable:$false] %s1112_s7 }
  0x76   : > { %917 = vmatpush3.bf16.msra.mxu0 %v916_v11  ;;  %p1115_p3 = scmp.lt.s32.totalorder %s707_s14, %s1113_s7 }
  0x77   : > { %902 = vmatprep.subr.mxu0 %v1235_v1  ;;  %923 = vmatpush3.bf16.msra.mxu1 %v922_v13  ;;  %p1111_p10 = pneg %p1110_p1 }
  0x78   : > { %907 = vmatprep.subr.mxu1 %v1235_v1 }
  0x79   : > { %889 = vmatmul.mubr.msk.f32.vlgmr.msra.gmra.mrb[0].mxu0 %vm339_vm1, %v327_v14 }
  0x7a   : > { %904 = vmatprep.mubr.msk.f32.mxu0 %vm1234_vm0, %v1235_v1  ;;  %900 = vmatmul.mubr.msk.f32.vlgmr.msra.gmra.mrb[0].mxu1 %vm339_vm1, %v327_v14 }
  0x7b   : > { %909 = vmatprep.mubr.msk.f32.mxu1 %vm1234_vm0, %v1235_v1 }
 0x14c   : > { %v409_v16 = vpop.f32.mrb[0].mxu0 }
 0x14d   : > { %v410_v17 = vadd.f32 %v853_v15, %v409_v16  ;;  %v890_v18 = vpop.f32.mrb[1].mxu0  ;;  %v503_v19 = vpop.f32.mrb[0].mxu1 }
 0x14e   : > { %v901_v20 = vpop.f32.mrb[1].mxu1  ;;  %v504_v22 = vadd.f32 %v855_v21, %v503_v19 }
 0x14f   : > { %413 = vst.msk [vmem:[#allocation2] sm:$0xff] %vm339_vm1, %v410_v17  ;;  %415 = vrot.lane.b32.xlu1 %v410_v17, %s1236_s9  ;;  %s1114_s9 = scalar_lea.vmem %s1113_s7, 256 }
 0x150   : > { %p1116_p5 = scmp.lt.s32.totalorder %s1114_s9, %s1108_s27 }
 0x152   : > { %p1117_p9 = por %p1116_p5, %p1115_p3 }
 0x154   : > { %p1118_p11 = pnand %p1117_p9, %p1111_p10 }
 0x156   : > { %v507_v23 = vld [vmem:[#allocation2] sm:$0xff] }
 0x157   : > { %903 = vmatpush3.xpose.msk.msra.mxu0 %vm339_vm1, %v507_v23 }
 0x15a   : > { %905 = vmatmul.mubr.msk.f32.vlgmr.msra.gmra.mrb[2].mxu0 %vm339_vm1, %v504_v22 }
 0x1c1   : > { %v416_v24 = vpop.permute.xlu1 %415 }
 0x1c2   : > { %418 = vst.msk [vmem:[#allocation3] sm:$0xff] %vm339_vm1, %v416_v24 }
 0x1c9   : > { %v596_v25 = vld [vmem:[#allocation3] sm:$0xff] }
 0x1ca   : > { %908 = vmatpush3.msra.mxu1 %v596_v25 }
 0x22d   : > { %v580_v26 = vpop.f32.mrb[2].mxu0 }
 0x22e   : > { %v906_v27 = vpop.f32.mrb[3].mxu0  ;;  %v585_v28 = vsel %vm584_vm2, %v580_v26, -inf }
 0x22f   : > { %586 = vmax.xlane.f32.xlu0 %v585_v28 }
 0x2bc   : > { %v587_v29 = vpop.xlane.xlu0 %586 }
 0x2bd   : > { %v588_v30 = vsub.f32 %v580_v26, %v587_v29 }
 0x2bf   : > { %v589_v31 = vmul.f32 1.442695, %v588_v30 }
 0x2c1   : > { %1018 = vpow2.f32 %v589_v31 }
 0x2cb   : > { %v1019_v32 = vpop.eup %1018 }
 0x2cc   : > { %v591_v33 = vsel %vm584_vm2, %v1019_v32, 0.0 }
 0x2cd   : > { %592 = vadd.xlane.f32.xlu0 %v591_v33 }
 0x35a   : > { %v593_v34 = vpop.xlane.xlu0 %592 }
 0x35b   : > { %1020 = vrcp.f32 %v593_v34 }
 0x365   : > { %v1021_v35 = vpop.eup %1020 }
 0x366   : > { %v595_v36 = vmul.f32 %v1021_v35, %v1019_v32 }
 0x368   : > { %910 = vmatmul.mubr.msk.f32.vlgmr.msra.gmra.mrb[2].mxu1 %vm584_vm2, %v595_v36  ;;  %671 = vst.msk [vmem:[%s322_s8] sm:$0xff] %vm584_vm2, %v595_v36 }
 0x369   : > { %1121 = shalt.err (!%p1118_p11)
}
 0x36a   : > { %s1122_s28 = scalar_lea.hbm %s1501_s18, 128  ;;  %s1126_s19 = scalar_lea.hbm %s1583_s6, 256 }
 0x36b   : > { %p1123_p0 = scmp.ne.s32.totalorder %s1501_s18, %s1122_s28  ;;  %p1127_p6 = scmp.lt.u32.totalorder %s1501_s18, %s1583_s6 }
 0x36c   : > { %p1128_p7 = scmp.lt.u32.totalorder %s1126_s19, %s1122_s28  ;;  %p1130_p8 = scmp.lt.u32.totalorder %s1122_s28, %s1501_s18 }
 0x36d   : > { %p1124_p4 = pnand %p1123_p0, %p1600_p12 }
 0x36e   : > { %p1129_p2 = por %p1128_p7, %p1127_p6 }
 0x36f   : > { %p1125_p13 = pneg %p1124_p4 }
 0x370   : > { %p1131_p1 = por %p1130_p8, %p1129_p2 }
 0x372   : > { %p1132_p10 = pnand %p1131_p1, %p1125_p13 }
 0x374   : > { %1135 = shalt.err (!%p1132_p10)
}
 0x375   : > { %935 = dma.vmem_to_hbm [thread:$0]  (%p1600_p12), %s707_s14, 128, %s1501_s18, %s678_s20  }
 0x376   : > { %s315_s27 = scalar_lea.vmem [#allocation10], %s1462_s10  ;;  %s1527_s8 = scalar_lea.hbm %s1582_s5, %s862_s15 }
 0x377   : > { %s692_s7 = sshll.u32 %s315_s27, 4  ;;  %s673_s28 = scalar_lea.sflag [#allocation6], %s1459_s17  ;;  %s1529_s7 = int_to_ptr.vmem [resolvable:$true] %s692_s7 }
 0x378   : > { %s1136_s19 = scalar_lea.vmem %s1529_s7, 128  ;;  %s1238_s24 = smov [#allocation10]  }
 0x379   : > { %p1137_p3 = scmp.ne.s32.totalorder %s1529_s7, %s1136_s19  ;;  %s1140_s10 = sshll.u32 %s1238_s24, 4  ;;  %s1141_s10 = int_to_ptr.vmem [resolvable:$false] %s1140_s10 }
 0x37a   : > { %s1142_s15 = scalar_lea.vmem %s1141_s10, 256  ;;  %p1143_p11 = scmp.lt.s32.totalorder %s1529_s7, %s1141_s10 }
 0x37b   : > { %p1138_p5 = pnand %p1137_p3, %p1600_p12  ;;  %p1144_p0 = scmp.lt.s32.totalorder %s1142_s15, %s1136_s19 }
 0x37d   : > { %p1139_p9 = pneg %p1138_p5  ;;  %p1145_p4 = por %p1144_p0, %p1143_p11 }
 0x37f   : > { %p1146_p13 = pnand %p1145_p4, %p1139_p9 }
 0x43b   : > { %v666_v37 = vpop.f32.mrb[2].mxu1 }
 0x43c   : > { %670 = vst.msk [vmem:[%s315_s27] sm:$0xff] %vm339_vm1, %v666_v37  ;;  %v911_v38 = vpop.f32.mrb[3].mxu1 }
 0x43d   : > { %1149 = shalt.err (!%p1146_p13)
}
 0x43e   : > { %s1150_s17 = scalar_lea.hbm %s1527_s8, 128  ;;  %s1154_s20 = scalar_lea.hbm %s1582_s5, 256 }
 0x43f   : > { %p1151_p6 = scmp.ne.s32.totalorder %s1527_s8, %s1150_s17  ;;  %p1155_p8 = scmp.lt.u32.totalorder %s1527_s8, %s1582_s5 }
 0x440   : > { %p1156_p1 = scmp.lt.u32.totalorder %s1154_s20, %s1150_s17  ;;  %p1158_p3 = scmp.lt.u32.totalorder %s1150_s17, %s1527_s8 }
 0x441   : > { %p1152_p7 = pnand %p1151_p6, %p1600_p12 }
 0x442   : > { %p1157_p10 = por %p1156_p1, %p1155_p8 }
 0x443   : > { %p1153_p2 = pneg %p1152_p7 }
 0x444   : > { %p1159_p5 = por %p1158_p3, %p1157_p10 }
 0x446   : > { %p1160_p9 = pnand %p1159_p5, %p1153_p2 }
 0x448   : > { %1163 = shalt.err (!%p1160_p9)
}
 0x449   : > { %934 = dma.vmem_to_hbm [thread:$0]  (%p1600_p12), %s1529_s7, 128, %s1527_s8, %s673_s28  }
 0x44a PF: > { %s1601_s27 = sld [smem:[#allocation17_spill]]  ;;  %s718_s9 = sand.u32 1, %s1206_s21  }
 0x44b   : > { %p1603_p0 = scmp.ge.s32.totalorder %s1226_s26, 2  ;;  %s719_s11 = scalar_lea.sflag [#allocation6], %s718_s9 }
 0x450   : > { %p1602_p11 = scmp.ne.s32.totalorder %s1601_s27, 0 }
 0x452   : > { %p950_p4 = pnand %p1603_p0, %p1602_p11 }
 0x454   : > { %1197 = dma.done.wait (!%p950_p4), %s719_s11, 128  }
 0x455   : > { %1199 = vsyncadd (!%p950_p4), %s719_s11, 4294967168  ;;  %s728_s19 = scalar_lea.sflag [#allocation12], %s718_s9 }
 0x456   : > { %1201 = dma.done.wait (!%p950_p4), %s728_s19, 128  }
 0x457   : > { %1203 = vsyncadd (!%p950_p4), %s728_s19, 4294967168  ;;  %s27_s26 = sadd.s32 1, %s1226_s26   ;;  %s1604_s21 = smov %s1210_s22 }
 0x458   : > { %p24_p13 = scmp.ge.s32.totalorder %s27_s26, 4   ;;  %s1605_s22 = smov %s1214_s23 }
 0x459   : > { %s1606_s23 = smov %s1416_s13  ;;  %s1607_s24 = smov %s1222_s25 }
 0x45a   : > { %s1608_s25 = smov %s1610_s16  ;;  %26 = sbr.rel (!%p24_p13) target bundleno = 9 (0x9), region = 115 }
 0x461   :  { %733 = vsyncpa [#allocation5], 1 }
 0x462   :  { %735 = vsyncpa [#allocation5 + $0x1], 1 }
 0x463   :  { %736 = vsyncpa [#allocation8], 1 }
 0x464   :  { %737 = vsyncpa [#allocation6], 1 }
 0x465   :  { %739 = vsyncpa [#allocation6 + $0x1], 1 }
 0x466   :  { %740 = vsyncpa [#allocation12], 1 }
 0x467   :  { %742 = vsyncpa [#allocation12 + $0x1], 1 }

</bundles_post_ra>
